<compile_context>
chip_gen: v7x
topology: tpu7x:2x2x1
jax: 0.10.0
libtpu: 0.0.40
codegen_flags: <defaults>
</compile_context>

<pallas_src>
import jax
import jax.numpy as jnp
from jax.experimental import pallas as pl
from jax.experimental.pallas import tpu as pltpu

INPUT_DIM = 2
DIM_FEAT = 256


# --------------------------------- kernel -----------------------------------
def gaze_encoder_kernel(x_ref, w1_ref, b1_ref, w2_ref, b2_ref, wc_ref, bc_ref,
                        o_ref):
    TB, F, Cin = x_ref.shape
    D = o_ref.shape[-1]
    N = TB * F

    # ---- input projection: Linear(Cin -> 64) + ReLU (Dropout identity in eval)
    xf = x_ref[...].reshape(N, Cin)                      # (N, Cin), Cin == 2
    w1 = w1_ref[...]                                     # (Cin, 64)
    h = b1_ref[...]                                      # (1, 64) broadcast once
    for c in range(Cin):                                 # Cin tiny -> VPU, not MXU
        h = h + xf[:, c:c + 1] * w1[c:c + 1, :]
    h = jnp.maximum(h, 0.0)                              # (N, 64)

    # ---- Linear(64 -> D): one MXU matmul over the whole block.
    xp = jnp.dot(h, w2_ref[...],
                 preferred_element_type=jnp.float32) + b2_ref[...]   # (N, D)

    # ---- Conv1d(D, D, k=3, pad=1) over frames via tap concatenation.
    xp3 = xp.reshape(TB, F, D)
    zrow = jnp.zeros((TB, 1, D), jnp.float32)
    prev = jnp.concatenate([zrow, xp3[:, :F - 1, :]], axis=1).reshape(N, D)
    nxt = jnp.concatenate([xp3[:, 1:, :], zrow], axis=1).reshape(N, D)
    patches = jnp.concatenate([prev, xp, nxt], axis=-1)              # (N, 3D)
    conv = jnp.dot(patches, wc_ref[...],
                   preferred_element_type=jnp.float32) + bc_ref[...]  # (N, D)

    # ---- residual add, single lane-dense bulk store.
    o_ref[...] = (xp + conv).reshape(TB, F, D)


# --------------------------------- wrapper -----------------------------------
def init_params(key, input_dim=INPUT_DIM, dim_feat=DIM_FEAT):
    ks = jax.random.split(key, 6)

    def u(k, shape, fan_in):
        s = 1.0 / jnp.sqrt(float(fan_in))
        return jax.random.uniform(k, shape, jnp.float32, -s, s)

    p = {}
    # Linear weights stored as (in, out) (== PyTorch (out, in) transposed).
    p["w1"] = u(ks[0], (input_dim, 64), input_dim)
    p["b1"] = u(ks[1], (1, 64), input_dim)
    p["w2"] = u(ks[2], (64, dim_feat), 64)
    p["b2"] = u(ks[3], (1, dim_feat), 64)
    # Conv1d(dim_feat, dim_feat, k=3) weight stored as (3*D, D):
    #   row k*D + ci, col co  ==  PyTorch conv.weight[co, ci, k]
    p["wc"] = u(ks[4], (3 * dim_feat, dim_feat), 3 * dim_feat)
    p["bc"] = u(ks[5], (1, dim_feat), 3 * dim_feat)
    return p


def gaze_encoder_forward(x, params):
    """x: (B, F, input_dim) float32 -> (B, F, dim_feat) float32."""
    B, F, Cin = x.shape
    D = params["w2"].shape[1]

    # Largest batch tile that still leaves >= 2 grid steps (feeds both v7x
    # TensorCores); falls back to the whole batch when B == 1.
    tile_b = 1
    for cand in range(B, 0, -1):
        if B % cand == 0 and B // cand >= min(B, 2):
            tile_b = cand
            break
    grid = (B // tile_b,)

    def full_spec(arr):
        return pl.BlockSpec(arr.shape, lambda b: (0,) * arr.ndim)

    return pl.pallas_call(
        gaze_encoder_kernel,
        out_shape=jax.ShapeDtypeStruct((B, F, D), jnp.float32),
        grid=grid,
        in_specs=[
            pl.BlockSpec((tile_b, F, Cin), lambda b: (b, 0, 0)),
            full_spec(params["w1"]), full_spec(params["b1"]),
            full_spec(params["w2"]), full_spec(params["b2"]),
            full_spec(params["wc"]), full_spec(params["bc"]),
        ],
        out_specs=pl.BlockSpec((tile_b, F, D), lambda b: (b, 0, 0)),
        compiler_params=pltpu.CompilerParams(
            dimension_semantics=("parallel",)),
    )(x.astype(jnp.float32), params["w1"], params["b1"], params["w2"],
      params["b2"], params["wc"], params["bc"])


def gaze_encoder_reference(x, params):
    """Pure-JAX reference with identical semantics (for verification)."""
    B, F, Cin = x.shape
    D = params["w2"].shape[1]
    xf = x.reshape(B * F, Cin)
    h = jnp.maximum(xf @ params["w1"] + params["b1"], 0.0)
    xp = (h @ params["w2"] + params["b2"]).reshape(B, F, D)
    z = jnp.zeros((B, 1, D), jnp.float32)
    prev = jnp.concatenate([z, xp[:, :-1, :]], axis=1)
    nxt = jnp.concatenate([xp[:, 1:, :], z], axis=1)
    wc = params["wc"]
    conv = (prev.reshape(B * F, D) @ wc[:D]
            + xp.reshape(B * F, D) @ wc[D:2 * D]
            + nxt.reshape(B * F, D) @ wc[2 * D:]
            + params["bc"]).reshape(B, F, D)
    return xp + conv


if __name__ == "__main__":
    key = jax.random.PRNGKey(0)
    pkey, xkey = jax.random.split(key)
    params = init_params(pkey)

    B, F = 4, 8  # batch, num_frames
    x = jax.random.normal(xkey, (B, F, INPUT_DIM), jnp.float32)

    out = jax.jit(gaze_encoder_forward)(x, params)
    out = jax.block_until_ready(out)
    assert out.shape == (B, F, DIM_FEAT), out.shape
    assert bool(jnp.all(jnp.isfinite(out)))

    ref = gaze_encoder_reference(x, params)
    assert bool(jnp.allclose(out, ref, atol=1e-4, rtol=1e-4)), \
        float(jnp.max(jnp.abs(out - ref)))

    print("KERNEL_OK")
</pallas_src>

<mosaic_0001>
module attributes {stable_mosaic.version = 11 : i64} {
  func.func @gaze_encoder_kernel(%arg0: i32, %arg1: memref<2x8x2xf32, #tpu.memory_space<vmem>>, %arg2: memref<2x64xf32, #tpu.memory_space<vmem>>, %arg3: memref<1x64xf32, #tpu.memory_space<vmem>>, %arg4: memref<64x256xf32, #tpu.memory_space<vmem>>, %arg5: memref<1x256xf32, #tpu.memory_space<vmem>>, %arg6: memref<768x256xf32, #tpu.memory_space<vmem>>, %arg7: memref<1x256xf32, #tpu.memory_space<vmem>>, %arg8: memref<2x8x256xf32, #tpu.memory_space<vmem>>) attributes {dimension_semantics = [#tpu.dimension_semantics<parallel>], iteration_bounds = array<i64: 2>, scalar_prefetch = 0 : i64, scratch_operands = 0 : i64, tpu.core_type = #tpu.core_type<tc>, window_params = [{transform_indices = @transform_0, window_bounds = array<i64: 2, 8, 2>}, {pipeline_mode = #tpu.pipeline_mode<synchronous>, transform_indices = @transform_1, window_bounds = array<i64: 2, 64>}, {pipeline_mode = #tpu.pipeline_mode<synchronous>, transform_indices = @transform_2, window_bounds = array<i64: 1, 64>}, {pipeline_mode = #tpu.pipeline_mode<synchronous>, transform_indices = @transform_3, window_bounds = array<i64: 64, 256>}, {pipeline_mode = #tpu.pipeline_mode<synchronous>, transform_indices = @transform_4, window_bounds = array<i64: 1, 256>}, {pipeline_mode = #tpu.pipeline_mode<synchronous>, transform_indices = @transform_5, window_bounds = array<i64: 768, 256>}, {pipeline_mode = #tpu.pipeline_mode<synchronous>, transform_indices = @transform_6, window_bounds = array<i64: 1, 256>}, {transform_indices = @transform_7, window_bounds = array<i64: 2, 8, 256>}]} {
    %c0 = arith.constant 0 : index
    %c0_0 = arith.constant 0 : index
    %c0_1 = arith.constant 0 : index
    %0 = vector.load %arg1[%c0, %c0_0, %c0_1] : memref<2x8x2xf32, #tpu.memory_space<vmem>>, vector<2x8x2xf32>
    %1 = vector.shape_cast %0 : vector<2x8x2xf32> to vector<16x2xf32>
    %c0_2 = arith.constant 0 : index
    %c0_3 = arith.constant 0 : index
    %2 = vector.load %arg2[%c0_2, %c0_3] : memref<2x64xf32, #tpu.memory_space<vmem>>, vector<2x64xf32>
    %c0_4 = arith.constant 0 : index
    %c0_5 = arith.constant 0 : index
    %3 = vector.load %arg3[%c0_4, %c0_5] : memref<1x64xf32, #tpu.memory_space<vmem>>, vector<1x64xf32>
    %4 = vector.extract_strided_slice %1 {offsets = [0, 0], sizes = [16, 1], strides = [1, 1]} : vector<16x2xf32> to vector<16x1xf32>
    %5 = vector.extract_strided_slice %2 {offsets = [0, 0], sizes = [1, 64], strides = [1, 1]} : vector<2x64xf32> to vector<1x64xf32>
    %6 = vector.broadcast %4 : vector<16x1xf32> to vector<16x64xf32>
    %7 = vector.broadcast %5 : vector<1x64xf32> to vector<16x64xf32>
    %8 = arith.mulf %6, %7 : vector<16x64xf32>
    %9 = vector.broadcast %3 : vector<1x64xf32> to vector<16x64xf32>
    %10 = arith.addf %9, %8 : vector<16x64xf32>
    %11 = vector.extract_strided_slice %1 {offsets = [0, 1], sizes = [16, 1], strides = [1, 1]} : vector<16x2xf32> to vector<16x1xf32>
    %12 = vector.extract_strided_slice %2 {offsets = [1, 0], sizes = [1, 64], strides = [1, 1]} : vector<2x64xf32> to vector<1x64xf32>
    %13 = vector.broadcast %11 : vector<16x1xf32> to vector<16x64xf32>
    %14 = vector.broadcast %12 : vector<1x64xf32> to vector<16x64xf32>
    %15 = arith.mulf %13, %14 : vector<16x64xf32>
    %16 = arith.addf %10, %15 : vector<16x64xf32>
    %cst = arith.constant 0.000000e+00 : f32
    %17 = vector.broadcast %cst : f32 to vector<16x64xf32>
    %18 = arith.maximumf %16, %17 : vector<16x64xf32>
    %c0_6 = arith.constant 0 : index
    %c0_7 = arith.constant 0 : index
    %19 = vector.load %arg4[%c0_6, %c0_7] : memref<64x256xf32, #tpu.memory_space<vmem>>, vector<64x256xf32>
    %cst_8 = arith.constant dense<0.000000e+00> : vector<16x256xf32>
    %20 = tpu.matmul %18, %19, %cst_8 {dimension_numbers = #tpu.dot_dimension_numbers<[1], [0], [0], [1], [0, 0, 1, 1], [], []>} : vector<16x64xf32>, vector<64x256xf32>, vector<16x256xf32> -> vector<16x256xf32>
    %c0_9 = arith.constant 0 : index
    %c0_10 = arith.constant 0 : index
    %21 = vector.load %arg5[%c0_9, %c0_10] : memref<1x256xf32, #tpu.memory_space<vmem>>, vector<1x256xf32>
    %22 = vector.broadcast %21 : vector<1x256xf32> to vector<16x256xf32>
    %23 = arith.addf %20, %22 : vector<16x256xf32>
    %24 = vector.shape_cast %23 : vector<16x256xf32> to vector<2x8x256xf32>
    %cst_11 = arith.constant 0.000000e+00 : f32
    %25 = vector.broadcast %cst_11 : f32 to vector<2x1x256xf32>
    %26 = vector.extract_strided_slice %24 {offsets = [0, 0, 0], sizes = [2, 7, 256], strides = [1, 1, 1]} : vector<2x8x256xf32> to vector<2x7x256xf32>
    %27 = tpu.concatenate %25, %26 in 1 : vector<2x1x256xf32>, vector<2x7x256xf32> -> vector<2x8x256xf32>
    %28 = vector.shape_cast %27 : vector<2x8x256xf32> to vector<16x256xf32>
    %29 = vector.extract_strided_slice %24 {offsets = [0, 1, 0], sizes = [2, 7, 256], strides = [1, 1, 1]} : vector<2x8x256xf32> to vector<2x7x256xf32>
    %30 = tpu.concatenate %29, %25 in 1 : vector<2x7x256xf32>, vector<2x1x256xf32> -> vector<2x8x256xf32>
    %31 = vector.shape_cast %30 : vector<2x8x256xf32> to vector<16x256xf32>
    %32 = tpu.concatenate %28, %23, %31 in 1 : vector<16x256xf32>, vector<16x256xf32>, vector<16x256xf32> -> vector<16x768xf32>
    %c0_12 = arith.constant 0 : index
    %c0_13 = arith.constant 0 : index
    %33 = vector.load %arg6[%c0_12, %c0_13] : memref<768x256xf32, #tpu.memory_space<vmem>>, vector<768x256xf32>
    %cst_14 = arith.constant dense<0.000000e+00> : vector<16x256xf32>
    %34 = tpu.matmul %32, %33, %cst_14 {dimension_numbers = #tpu.dot_dimension_numbers<[1], [0], [0], [1], [0, 0, 1, 1], [], []>} : vector<16x768xf32>, vector<768x256xf32>, vector<16x256xf32> -> vector<16x256xf32>
    %c0_15 = arith.constant 0 : index
    %c0_16 = arith.constant 0 : index
    %35 = vector.load %arg7[%c0_15, %c0_16] : memref<1x256xf32, #tpu.memory_space<vmem>>, vector<1x256xf32>
    %36 = vector.broadcast %35 : vector<1x256xf32> to vector<16x256xf32>
    %37 = arith.addf %34, %36 : vector<16x256xf32>
    %38 = arith.addf %23, %37 : vector<16x256xf32>
    %39 = vector.shape_cast %38 : vector<16x256xf32> to vector<2x8x256xf32>
    %c0_17 = arith.constant 0 : index
    %c0_18 = arith.constant 0 : index
    %c0_19 = arith.constant 0 : index
    %40 = vector.load %arg8[%c0_17, %c0_18, %c0_19] : memref<2x8x256xf32, #tpu.memory_space<vmem>>, vector<2x8x256xf32>
    tpu.vector_store %arg8[%c0_17, %c0_18, %c0_19], %39 {strides = array<i32>} : memref<2x8x256xf32, #tpu.memory_space<vmem>>, vector<2x8x256xf32>,
    return
  }
  func.func @transform_0(%arg0: i32) -> (i32, i32, i32) {
    %c0_i32 = arith.constant 0 : i32
    %c0_i32_0 = arith.constant 0 : i32
    %c0_i32_1 = arith.constant 0 : i32
    return %arg0, %c0_i32, %c0_i32_0 : i32, i32, i32
  }
  func.func @transform_1(%arg0: i32) -> (i32, i32) {
    %c0_i32 = arith.constant 0 : i32
    %c0_i32_0 = arith.constant 0 : i32
    %c0_i32_1 = arith.constant 0 : i32
    return %c0_i32, %c0_i32_0 : i32, i32
  }
  func.func @transform_2(%arg0: i32) -> (i32, i32) {
    %c0_i32 = arith.constant 0 : i32
    %c0_i32_0 = arith.constant 0 : i32
    %c0_i32_1 = arith.constant 0 : i32
    return %c0_i32, %c0_i32_0 : i32, i32
  }
  func.func @transform_3(%arg0: i32) -> (i32, i32) {
    %c0_i32 = arith.constant 0 : i32
    %c0_i32_0 = arith.constant 0 : i32
    %c0_i32_1 = arith.constant 0 : i32
    return %c0_i32, %c0_i32_0 : i32, i32
  }
  func.func @transform_4(%arg0: i32) -> (i32, i32) {
    %c0_i32 = arith.constant 0 : i32
    %c0_i32_0 = arith.constant 0 : i32
    %c0_i32_1 = arith.constant 0 : i32
    return %c0_i32, %c0_i32_0 : i32, i32
  }
  func.func @transform_5(%arg0: i32) -> (i32, i32) {
    %c0_i32 = arith.constant 0 : i32
    %c0_i32_0 = arith.constant 0 : i32
    %c0_i32_1 = arith.constant 0 : i32
    return %c0_i32, %c0_i32_0 : i32, i32
  }
  func.func @transform_6(%arg0: i32) -> (i32, i32) {
    %c0_i32 = arith.constant 0 : i32
    %c0_i32_0 = arith.constant 0 : i32
    %c0_i32_1 = arith.constant 0 : i32
    return %c0_i32, %c0_i32_0 : i32, i32
  }
  func.func @transform_7(%arg0: i32) -> (i32, i32, i32) {
    %c0_i32 = arith.constant 0 : i32
    %c0_i32_0 = arith.constant 0 : i32
    %c0_i32_1 = arith.constant 0 : i32
    return %arg0, %c0_i32, %c0_i32_0 : i32, i32, i32
  }
}

</mosaic_0001>

<bundles_post_ra>
// kernel: gaze_encoder_forward.1
= control target key start
LH: loop header
LB: loop body
LE: loop exit
PB: predicated region body
PF: predicated region fallthrough
CT: control target
= control target key end

     0   :  { %12 = vsyncpa [#allocation3], 0  ;;  %s1783_s0 = inlined_call_operand.vmem [shape: f32[4,8,2], index: 0, kind: input, shape index: {}]   ;;  %s1784_s1 = inlined_call_operand.vmem [shape: f32[2,64], index: 1, kind: input, shape index: {}]   ;;  %s1785_s2 = inlined_call_operand.vmem [shape: f32[1,64], index: 2, kind: input, shape index: {}]   ;;  %s1786_s3 = inlined_call_operand.hbm [shape: f32[64,256], index: 3, kind: input, shape index: {}]   ;;  %s1787_s4 = inlined_call_operand.vmem [shape: f32[1,256], index: 4, kind: input, shape index: {}]   ;;  %s1788_s5 = inlined_call_operand.hbm [shape: f32[768,256], index: 5, kind: input, shape index: {}]   ;;  %s1789_s6 = inlined_call_operand.vmem [shape: f32[1,256], index: 6, kind: input, shape index: {}]   ;;  %s1790_s7 = inlined_call_operand.hbm [shape: f32[4,8,256], index: 7, kind: output, shape index: {}]  }
   0x1   :  { %13 = vsyncpa [#allocation6], 0 }
   0x2   :  { %14 = vsyncpa [#allocation4], 0 }
   0x3   :  { %16 = vsyncpa [#allocation4 + $0x1], 0  ;;  %s1543_s24 = smov 0   ;;  %s1545_s25 = smov 0  }
   0x4   :  { %s1547_s26 = smov 0   ;;  %s1549_s27 = smov 0  }
   0x5 LB: > { %s1564_s28 = sadd.s32 4294967295, %s1491_s27   ;;  %s1040_s29 = sadd.s32 4294967294, %s1491_s27   ;;  %s1491_s27 = sphi %s1549_s27, %s1812_s27   ;;  %s1487_s26 = sphi %s1547_s26, %s1811_s26   ;;  %s1483_s25 = sphi %s1545_s25, %s1810_s25   ;;  %s1479_s24 = sphi %s1543_s24, %s1809_s24  }
   0x6   : > { %s1568_s30 = sadd.s32 1, %s1491_s27   ;;  %s181_s8 = sadd.s32 1, %s1487_s26 }
   0x7   : > { %s178_s9 = ssub.s32 %s1491_s27, %s1568_s30  ;;  %p191_p0 = scmp.ne.s32.totalorder %s1487_s26, %s1483_s25 }
   0x8   : > { %p179_p1 = scmp.eq.s32.totalorder %s178_s9, 0  ;;  %p192_p2 = scmp.eq.s32.totalorder %s1564_s28, 1 }
   0x9   : > { %p197_p3 = scmp.ne.s32.totalorder %s1483_s25, %s1479_s24  ;;  %p198_p4 = scmp.eq.s32.totalorder %s1040_s29, 1 }
   0xa   : > { %s1579_s10 = scalar_select %p179_p1, %s1487_s26, %s181_s8  }
   0xb   : > { %p1581_p5 = por %p192_p2, %p191_p0  ;;  %p1585_p6 = por %p198_p4, %p197_p3 }
   0xc   : > { %1794 = sst [smem:[#allocation11_spill]] %s1579_s10  ;;  %p1041_p7 = scmp.ge.s32.totalorder %s1491_s27, 1 }
   0xd   : > { %s1795_s11 = scalar_select %p1581_p5, 1, 0 }
   0xe   : > { %s1796_s12 = scalar_select %p1585_p6, 1, 0 }
   0xf   : > { %p205_p8 = scmp.lt.s32.totalorder %s1491_s27, 3  ;;  %p1791_p9 = scmp.eq.s32.totalorder %s1564_s28, 0 }
  0x10   : > { %s1493_s14 = smov [#allocation2]   ;;  %s1494_s17 = smov [#allocation5]  }
  0x11   : > { %p1592_p10 = pnand %p1041_p7, %p205_p8  ;;  %s223_s15 = sshll.u32 %s1493_s14, 4  ;;  %s224_s15 = int_to_ptr.vmem [resolvable:$true] %s223_s15 }
  0x12   : > { %s239_s18 = sshll.u32 %s1494_s17, 4  ;;  %s1365_s21 = scalar_lea.hbm %s1786_s3, 2048  ;;  %s1604_s18 = int_to_ptr.vmem [resolvable:$true] %s239_s18 }
  0x13   : > { %s1797_s13 = scalar_select %p1592_p10, 1, 0 }
  0x14   : > { %p1304_p11 = pneg %p1592_p10  ;;  %p1366_p13 = scmp.ne.s32.totalorder %s1786_s3, %s1365_s21 }
  0x15   : > { %p1372_p3 = scmp.lt.u32.totalorder %s1365_s21, %s1786_s3 }
  0x16   : > { %p1600_p12 = pnand %p1791_p9, %p1304_p11 }
  0x18   : > { %p1367_p0 = pneg %p1600_p12 }
  0x1a   : > { %p1368_p1 = pnand %p1367_p0, %p1366_p13 }
  0x1c   : > { %p1369_p2 = pneg %p1368_p1 }
  0x1e   : > { %p1374_p4 = pnand %p1372_p3, %p1369_p2 }
  0x20   : > { %1377 = shalt.err (!%p1374_p4)
}
  0x21   : > { %s1378_s9 = scalar_lea.vmem %s224_s15, 2048  ;;  %p1386_p9 = scmp.lt.s32.totalorder %s224_s15, %s224_s15 }
  0x22   : > { %p1379_p7 = scmp.ne.s32.totalorder %s224_s15, %s1378_s9  ;;  %p1387_p6 = scmp.lt.s32.totalorder %s1378_s9, %s1378_s9 }
  0x24   : > { %p1381_p8 = pnand %p1379_p7, %p1367_p0  ;;  %p1388_p5 = por %p1387_p6, %p1386_p9 }
  0x26   : > { %p1382_p11 = pneg %p1381_p8 }
  0x28   : > { %p1389_p10 = pnand %p1388_p5, %p1382_p11 }
  0x2a   : > { %1392 = shalt.err (!%p1389_p10)
}
  0x2b   : > { %s1495_s14 = smov 256   ;;  %s1496_s17 = smov 16  }
  0x2c   : > { %1307 = dma.hbm_to_vmem [thread:$0]  (!%p1600_p12), %s1786_s3, 2048, %s224_s15, [#allocation3], %s1495_s14, %s1495_s14, %s1496_s17  }
  0x2d   : > { %s1393_s23 = scalar_lea.hbm %s1788_s5, 24576 }
  0x2e   : > { %p1394_p13 = scmp.ne.s32.totalorder %s1788_s5, %s1393_s23  ;;  %p1400_p9 = scmp.lt.u32.totalorder %s1393_s23, %s1788_s5 }
  0x30   : > { %p1396_p5 = pnand %p1394_p13, %p1367_p0 }
  0x32   : > { %p1397_p6 = pneg %p1396_p5 }
  0x34   : > { %p1402_p10 = pnand %p1400_p9, %p1397_p6 }
  0x36   : > { %1405 = shalt.err (!%p1402_p10)
}
  0x37   : > { %s1406_s15 = scalar_lea.vmem %s1604_s18, 24576  ;;  %p1414_p4 = scmp.lt.s32.totalorder %s1604_s18, %s1604_s18 }
  0x38   : > { %p1407_p1 = scmp.ne.s32.totalorder %s1604_s18, %s1406_s15  ;;  %p1415_p7 = scmp.lt.s32.totalorder %s1406_s15, %s1406_s15 }
  0x3a   : > { %p1409_p2 = pnand %p1407_p1, %p1367_p0  ;;  %p1416_p8 = por %p1415_p7, %p1414_p4 }
  0x3c   : > { %p1410_p3 = pneg %p1409_p2 }
  0x3e   : > { %p1417_p11 = pnand %p1416_p8, %p1410_p3 }
  0x40   : > { %1420 = shalt.err (!%p1417_p11)
}
  0x41   : > { %1310 = dma.hbm_to_vmem [thread:$0]  (!%p1600_p12), %s1788_s5, 24576, %s1604_s18, [#allocation6], %s1495_s14, %s1495_s14, %s1496_s17  }
  0x42   : > { %p1799_p13 = scmp.ne.s32.totalorder %s1797_s13, 0 }
  0x43   : > { %p1800_p5 = scmp.eq.s32.totalorder (!%p1799_p13), %s1564_s28, 0 }
  0x44   : > { %267 = sbr.rel (%p1799_p13) target bundleno = 742 (0x2e6), region = 48 }
  0x4b   : > { %1466 = dma.done.wait (%p1800_p5), [#allocation3], 2048   ;;  %p1801_p0 = pmov %p1800_p5 }
  0x4d   : > { %1468 = vsyncadd (%p1801_p0), [#allocation3], 4294965248  ;;  %p1802_p6 = pmov %p1801_p0 }
  0x4e   : > { %p1803_p9 = pmov %p1801_p0 }
  0x4f   : > { %1470 = dma.done.wait (%p1802_p6), [#allocation6], 24576  }
  0x50   : > { %1472 = vsyncadd (%p1803_p9), [#allocation6], 4294942720  ;;  %s1049_s16 = sshll.u32 %s1564_s28, 1  ;;  %v1497_v0 = vmov 0   ;;  %v357_v3 = vld [vmem:[#allocation2 + $0x8] sm:$0xff]  ;;  %v359_v4 = vld [vmem:[#allocation2 + $0x18] sm:$0xff] }
  0x51   : > { %1361 = vset.pattern.permute.xlu0 %v1497_v0  ;;  %p304_p12 = scmp.lt.s32.totalorder %s1049_s16, 3  ;;  %1363 = vset.pattern.permute.xlu1 %v1497_v0  ;;  %v356_v5 = vld [vmem:[#allocation2] sm:$0xff]  ;;  %v358_v6 = vld [vmem:[#allocation2 + $0x10] sm:$0xff]  ;;  %v1074_v7 = vpack.c.bf16 %v359_v4, %v357_v3  ;;  %v361_v8 = vld [vmem:[#allocation2 + $0x28] sm:$0xff]  ;;  %v1498_v14 = vmov 1   ;;  %v1499_v24 = vmov 0.0  }
  0x52   : > { %v363_v9 = vld [vmem:[#allocation2 + $0x38] sm:$0xff]  ;;  %v1076_v10 = vpack.c.bf16 %v358_v6, %v356_v5  ;;  %v360_v12 = vld [vmem:[#allocation2 + $0x20] sm:$0xff]  ;;  %v362_v13 = vld [vmem:[#allocation2 + $0x30] sm:$0xff]  ;;  %455 = vmatprep.mubr.f32.mxu0 %v1499_v24  ;;  %vm384_vm0 = vcmask 523264   ;;  %vm480_vm1 = vcmask 1040384   ;;  %vm493_vm3 = vcmask 1046528  }
  0x53   : > { %s1814_s16 = smov (!%p304_p12, %s1049_s16), 3  ;;  %1075 = vmatprep.subr.bf16.mxu0 %v1074_v7  ;;  %v1078_v11 = vpack.c.bf16 %v363_v9, %v361_v8  ;;  %v365_v15 = vld [vmem:[#allocation2 + $0x48] sm:$0xff]  ;;  %v367_v16 = vld [vmem:[#allocation2 + $0x58] sm:$0xff]  ;;  %v1080_v17 = vpack.c.bf16 %v362_v13, %v360_v12  ;;  %v364_v19 = vld [vmem:[#allocation2 + $0x40] sm:$0xff]  ;;  %s300_s10 = sand.u32 1, %s1483_s25  }
  0x54   : > { %s1050_s13 = sshll.u32 %s1814_s16, 3  ;;  %1077 = vmatpush1.bf16.msra.mxu0 %v1076_v10  ;;  %v1082_v18 = vpack.c.bf16 %v367_v16, %v365_v15  ;;  %v366_v20 = vld [vmem:[#allocation2 + $0x50] sm:$0xff]  ;;  %v369_v21 = vld [vmem:[#allocation2 + $0x68] sm:$0xff]  ;;  %v371_v22 = vld [vmem:[#allocation2 + $0x78] sm:$0xff]  ;;  %s1048_s19 = sshll.u32 %s300_s10, 5 }
  0x55   : > { %s307_s17 = scalar_lea.vmem %s1783_s0, %s1050_s13  ;;  %1079 = vmatprep.subr.bf16.mxu0 %v1078_v11  ;;  %v1084_v23 = vpack.c.bf16 %v366_v20, %v364_v19  ;;  %v1086_v25 = vpack.c.bf16 %v371_v22, %v369_v21  ;;  %v368_v26 = vld [vmem:[#allocation2 + $0x60] sm:$0xff]  ;;  %v370_v27 = vld [vmem:[#allocation2 + $0x70] sm:$0xff]  ;;  %v563_v29 = vld [vmem:[#allocation5 + $0x208] sm:$0xff]  ;;  %s302_s16 = scalar_lea.vmem [#allocation7], %s1048_s19 }
  0x56   : > { %v310_v1 = vld [vmem:[%s307_s17] sm:$0xff]  ;;  %v311_v2 = vld [vmem:[%s307_s17 + $0x8] sm:$0xff]  ;;  %v1088_v28 = vpack.c.bf16 %v370_v27, %v368_v26  ;;  %v565_v30 = vld [vmem:[#allocation5 + $0x218] sm:$0xff]  ;;  %s956_s13 = sshll.u32 %s302_s16, 4  ;;  %s1073_s18 = sshll.u32 %s1564_s28, 9  ;;  %s1733_s13 = int_to_ptr.vmem [resolvable:$true] %s956_s13 }
  0x57   : > { %316 = vperm.xlu0 %1361, %v310_v1   ;;  %321 = vperm.xlu1 %1363, %v311_v2   ;;  %v562_v31 = vld [vmem:[#allocation5 + $0x200] sm:$0xff]  ;;  %v1154_v32 = vpack.c.bf16 %v565_v30, %v563_v29  ;;  %v564_v33 = vld [vmem:[#allocation5 + $0x210] sm:$0xff]  ;;  %v499_v34 = vld [vmem:[#allocation5 + $0x8] sm:$0xff]  ;;  %s1739_s20 = scalar_lea.hbm %s1790_s7, %s1073_s18  ;;  %s1742_s28 = scalar_lea.sflag [#allocation4], %s300_s10 }
  0x58   : > { %1081 = vmatpush1.bf16.msra.mxu0 %v1080_v17  ;;  %v501_v35 = vld [vmem:[#allocation5 + $0x18] sm:$0xff]  ;;  %v1156_v36 = vpack.c.bf16 %v564_v33, %v562_v31  ;;  %v567_v38 = vld [vmem:[#allocation5 + $0x228] sm:$0xff]  ;;  %v566_v40 = vld [vmem:[#allocation5 + $0x220] sm:$0xff]  ;;  %s1421_s21 = scalar_lea.vmem %s1733_s13, 512  ;;  %p1806_p1 = scmp.ne.s32.totalorder %s1795_s11, 0 }
  0x59   : > { %1083 = vmatprep.subr.bf16.mxu0 %v1082_v18  ;;  %v1090_v37 = vpack.c.bf16 %v501_v35, %v499_v34  ;;  %1155 = vmatprep.subr.bf16.mxu1 %v1154_v32  ;;  %v569_v39 = vld [vmem:[#allocation5 + $0x238] sm:$0xff]  ;;  %v568_v41 = vld [vmem:[#allocation5 + $0x230] sm:$0xff]  ;;  %v571_v44 = vld [vmem:[#allocation5 + $0x248] sm:$0xff]  ;;  %p1422_p10 = scmp.ne.s32.totalorder %s1733_s13, %s1421_s21  ;;  %s1500_s22 = smov [#allocation7]  }
  0x5a   : > { %1157 = vmatpush1.bf16.msra.mxu1 %v1156_v36  ;;  %v1158_v42 = vpack.c.bf16 %v569_v39, %v567_v38  ;;  %v1160_v43 = vpack.c.bf16 %v568_v41, %v566_v40  ;;  %v573_v45 = vld [vmem:[#allocation5 + $0x258] sm:$0xff]  ;;  %v570_v47 = vld [vmem:[#allocation5 + $0x240] sm:$0xff]  ;;  %v572_v48 = vld [vmem:[#allocation5 + $0x250] sm:$0xff]  ;;  %s1425_s23 = sshll.u32 %s1500_s22, 4  ;;  %s1426_s23 = int_to_ptr.vmem [resolvable:$false] %s1425_s23 }
  0x5b   : > { %1362 = vset.pattern.permute.xlu0 %v1498_v14  ;;  %1364 = vset.pattern.permute.xlu1 %v1498_v14  ;;  %v1162_v46 = vpack.c.bf16 %v573_v45, %v571_v44  ;;  %v1164_v49 = vpack.c.bf16 %v572_v48, %v570_v47  ;;  %v575_v50 = vld [vmem:[#allocation5 + $0x268] sm:$0xff]  ;;  %v577_v51 = vld [vmem:[#allocation5 + $0x278] sm:$0xff]  ;;  %v574_v53 = vld [vmem:[#allocation5 + $0x260] sm:$0xff]  ;;  %p1423_p2 = pnand %p1422_p10, %p1806_p1  ;;  %s1427_s29 = scalar_lea.vmem %s1426_s23, 1024 }
  0x5c   : > { %339 = vperm.xlu0 %1362, %v310_v1   ;;  %343 = vperm.xlu1 %1364, %v311_v2   ;;  %v1166_v52 = vpack.c.bf16 %v577_v51, %v575_v50  ;;  %v576_v54 = vld [vmem:[#allocation5 + $0x270] sm:$0xff]  ;;  %v579_v55 = vld [vmem:[#allocation5 + $0x288] sm:$0xff]  ;;  %v581_v56 = vld [vmem:[#allocation5 + $0x298] sm:$0xff]  ;;  %p1428_p4 = scmp.lt.s32.totalorder %s1733_s13, %s1426_s23  ;;  %p1429_p7 = scmp.lt.s32.totalorder %s1427_s29, %s1421_s21 }
  0x5d   : > { %1085 = vmatpush1.bf16.msra.mxu0 %v1084_v23  ;;  %1159 = vmatprep.subr.bf16.mxu1 %v1158_v42  ;;  %v1168_v57 = vpack.c.bf16 %v576_v54, %v574_v53  ;;  %v1170_v58 = vpack.c.bf16 %v581_v56, %v579_v55  ;;  %v578_v59 = vld [vmem:[#allocation5 + $0x280] sm:$0xff]  ;;  %v580_v60 = vld [vmem:[#allocation5 + $0x290] sm:$0xff]  ;;  %v583_v61 = vld [vmem:[#allocation5 + $0x2a8] sm:$0xff]  ;;  %p1424_p3 = pneg %p1423_p2 }
  0x5e   : > { %1087 = vmatprep.subr.bf16.mxu0 %v1086_v25  ;;  %1161 = vmatpush1.bf16.msra.mxu1 %v1160_v43  ;;  %v585_v62 = vld [vmem:[#allocation5 + $0x2b8] sm:$0xff]  ;;  %v1172_v63 = vpack.c.bf16 %v580_v60, %v578_v59  ;;  %v582_v1 = vld [vmem:[#allocation5 + $0x2a0] sm:$0xff]  ;;  %v584_v2 = vld [vmem:[#allocation5 + $0x2b0] sm:$0xff]  ;;  %v324_v59 = vlaneseq  ;;  %p1430_p8 = por %p1429_p7, %p1428_p4 }
  0x5f   : > { %1163 = vmatprep.subr.bf16.mxu1 %v1162_v46  ;;  %v1174_v0 = vpack.c.bf16 %v585_v62, %v583_v61  ;;  %v587_v3 = vld [vmem:[#allocation5 + $0x2c8] sm:$0xff]  ;;  %v589_v4 = vld [vmem:[#allocation5 + $0x2d8] sm:$0xff]  ;;  %v1176_v5 = vpack.c.bf16 %v584_v2, %v582_v1  ;;  %v586_v7 = vld [vmem:[#allocation5 + $0x2c0] sm:$0xff] }
  0x60   : > { %v1178_v6 = vpack.c.bf16 %v589_v4, %v587_v3  ;;  %v588_v8 = vld [vmem:[#allocation5 + $0x2d0] sm:$0xff]  ;;  %v591_v9 = vld [vmem:[#allocation5 + $0x2e8] sm:$0xff]  ;;  %v593_v10 = vld [vmem:[#allocation5 + $0x2f8] sm:$0xff]  ;;  %v325_v60 = vshrl.u32 %v324_v59, 7  ;;  %p1431_p11 = pnand %p1430_p8, %p1424_p3 }
  0x61   : > { %1089 = vmatpush1.bf16.msra.mxu0 %v1088_v28  ;;  %v1180_v11 = vpack.c.bf16 %v588_v8, %v586_v7  ;;  %v1182_v12 = vpack.c.bf16 %v593_v10, %v591_v9  ;;  %v590_v13 = vld [vmem:[#allocation5 + $0x2e0] sm:$0xff]  ;;  %v592_v14 = vld [vmem:[#allocation5 + $0x2f0] sm:$0xff]  ;;  %v595_v15 = vld [vmem:[#allocation5 + $0x308] sm:$0xff] }
  0x62   : > { %1091 = vmatprep.subr.bf16.mxu0 %v1090_v37  ;;  %1165 = vmatpush1.bf16.msra.mxu1 %v1164_v49  ;;  %v597_v16 = vld [vmem:[#allocation5 + $0x318] sm:$0xff]  ;;  %v1184_v17 = vpack.c.bf16 %v592_v14, %v590_v13  ;;  %v594_v19 = vld [vmem:[#allocation5 + $0x300] sm:$0xff]  ;;  %v596_v20 = vld [vmem:[#allocation5 + $0x310] sm:$0xff]  ;;  %v1668_v61 = vsub.s32 0, %v325_v60 }
  0x63   : > { %1167 = vmatprep.subr.bf16.mxu1 %v1166_v52  ;;  %v1186_v18 = vpack.c.bf16 %v597_v16, %v595_v15  ;;  %v599_v21 = vld [vmem:[#allocation5 + $0x328] sm:$0xff]  ;;  %v601_v22 = vld [vmem:[#allocation5 + $0x338] sm:$0xff]  ;;  %v1188_v23 = vpack.c.bf16 %v596_v20, %v594_v19  ;;  %v598_v26 = vld [vmem:[#allocation5 + $0x320] sm:$0xff] }
  0x64   : > { %v1190_v25 = vpack.c.bf16 %v601_v22, %v599_v21  ;;  %v600_v27 = vld [vmem:[#allocation5 + $0x330] sm:$0xff]  ;;  %v603_v28 = vld [vmem:[#allocation5 + $0x348] sm:$0xff]  ;;  %v605_v29 = vld [vmem:[#allocation5 + $0x358] sm:$0xff] }
  0x65   : > { %v1192_v30 = vpack.c.bf16 %v600_v27, %v598_v26  ;;  %v1194_v31 = vpack.c.bf16 %v605_v29, %v603_v28  ;;  %v602_v32 = vld [vmem:[#allocation5 + $0x340] sm:$0xff]  ;;  %v604_v33 = vld [vmem:[#allocation5 + $0x350] sm:$0xff]  ;;  %v607_v34 = vld [vmem:[#allocation5 + $0x368] sm:$0xff] }
  0x66   : > { %1169 = vmatpush1.bf16.msra.mxu1 %v1168_v57  ;;  %v609_v35 = vld [vmem:[#allocation5 + $0x378] sm:$0xff]  ;;  %v1196_v36 = vpack.c.bf16 %v604_v33, %v602_v32  ;;  %v606_v38 = vld [vmem:[#allocation5 + $0x360] sm:$0xff]  ;;  %v608_v39 = vld [vmem:[#allocation5 + $0x370] sm:$0xff] }
  0x67   : > { %1171 = vmatprep.subr.bf16.mxu1 %v1170_v58  ;;  %v1198_v37 = vpack.c.bf16 %v609_v35, %v607_v34  ;;  %v611_v40 = vld [vmem:[#allocation5 + $0x388] sm:$0xff]  ;;  %v613_v41 = vld [vmem:[#allocation5 + $0x398] sm:$0xff]  ;;  %v1200_v42 = vpack.c.bf16 %v608_v39, %v606_v38  ;;  %v610_v44 = vld [vmem:[#allocation5 + $0x380] sm:$0xff] }
  0x68   : > { %v1202_v43 = vpack.c.bf16 %v613_v41, %v611_v40  ;;  %v612_v45 = vld [vmem:[#allocation5 + $0x390] sm:$0xff]  ;;  %v615_v46 = vld [vmem:[#allocation5 + $0x3a8] sm:$0xff]  ;;  %v617_v47 = vld [vmem:[#allocation5 + $0x3b8] sm:$0xff] }
  0x69   : > { %v1204_v48 = vpack.c.bf16 %v612_v45, %v610_v44  ;;  %v1206_v49 = vpack.c.bf16 %v617_v47, %v615_v46  ;;  %v614_v50 = vld [vmem:[#allocation5 + $0x3a0] sm:$0xff]  ;;  %v616_v51 = vld [vmem:[#allocation5 + $0x3b0] sm:$0xff]  ;;  %v619_v52 = vld [vmem:[#allocation5 + $0x3c8] sm:$0xff] }
  0x6a   : > { %1173 = vmatpush1.bf16.msra.mxu1 %v1172_v63  ;;  %v621_v53 = vld [vmem:[#allocation5 + $0x3d8] sm:$0xff]  ;;  %v1208_v54 = vpack.c.bf16 %v616_v51, %v614_v50  ;;  %v618_v56 = vld [vmem:[#allocation5 + $0x3c0] sm:$0xff]  ;;  %v620_v57 = vld [vmem:[#allocation5 + $0x3d0] sm:$0xff] }
  0x6b   : > { %1175 = vmatprep.subr.bf16.mxu1 %v1174_v0  ;;  %v1210_v55 = vpack.c.bf16 %v621_v53, %v619_v52  ;;  %v1212_v58 = vpack.c.bf16 %v620_v57, %v618_v56  ;;  %v312_v62 = vld [vmem:[%s1784_s1] sm:$0x3]  ;;  %v1674_v0 = vsub.s32 1, %v325_v60  ;;  %v500_v14 = vld [vmem:[#allocation5 + $0x10] sm:$0xff]  ;;  %v503_v15 = vld [vmem:[#allocation5 + $0x28] sm:$0xff] }
  0x6c   : > { %v327_v63 = vrot.slane %v312_v62, %v1668_v61  ;;  %v498_v13 = vld [vmem:[#allocation5] sm:$0xff]  ;;  %v505_v16 = vld [vmem:[#allocation5 + $0x38] sm:$0xff]  ;;  %v511_v32 = vld [vmem:[#allocation5 + $0x68] sm:$0xff] }
  0x6d   : > { %v1092_v19 = vpack.c.bf16 %v500_v14, %v498_v13  ;;  %v1094_v21 = vpack.c.bf16 %v505_v16, %v503_v15  ;;  %v502_v22 = vld [vmem:[#allocation5 + $0x20] sm:$0xff]  ;;  %v509_v26 = vld [vmem:[#allocation5 + $0x58] sm:$0xff]  ;;  %v515_v38 = vld [vmem:[#allocation5 + $0x88] sm:$0xff] }
  0x6e   : > { %1177 = vmatpush1.bf16.msra.mxu1 %v1176_v5  ;;  %v349_v5 = vrot.slane %v312_v62, %v1674_v0  ;;  %v513_v33 = vld [vmem:[#allocation5 + $0x78] sm:$0xff]  ;;  %v514_v41 = vld [vmem:[#allocation5 + $0x80] sm:$0xff]  ;;  %v528_v60 = vld [vmem:[#allocation5 + $0xf0] sm:$0xff] }
  0x6f   : > { %1179 = vmatprep.subr.bf16.mxu1 %v1178_v6  ;;  %v1051_v6 = vld [vmem:[%s1785_s2] ss:$0 sm:$0xff]  ;;  %v1102_v35 = vpack.c.bf16 %v513_v33, %v511_v32  ;;  %v517_v39 = vld [vmem:[#allocation5 + $0x98] sm:$0xff]  ;;  %v531_v62 = vld [vmem:[#allocation5 + $0x108] sm:$0xff] }
  0x70   : > { %v1106_v40 = vpack.c.bf16 %v517_v39, %v515_v38  ;;  %v521_v44 = vld [vmem:[#allocation5 + $0xb8] sm:$0xff]  ;;  %v518_v47 = vld [vmem:[#allocation5 + $0xa0] sm:$0xff]  ;;  %v540_v16 = vld [vmem:[#allocation5 + $0x150] sm:$0xff] }
  0x71   : > { %v525_v50 = vld [vmem:[#allocation5 + $0xd8] sm:$0xff]  ;;  %v522_v53 = vld [vmem:[#allocation5 + $0xc0] sm:$0xff]  ;;  %vm1692_vm2 = vmneg %vm480_vm1 }
  0x72   : > { %1181 = vmatpush1.bf16.msra.mxu1 %v1180_v11  ;;  %v529_v56 = vld [vmem:[#allocation5 + $0xf8] sm:$0xff]  ;;  %v526_v59 = vld [vmem:[#allocation5 + $0xe0] sm:$0xff] }
  0x73   : > { %1183 = vmatprep.subr.bf16.mxu1 %v1182_v12  ;;  %v538_v15 = vld [vmem:[#allocation5 + $0x140] sm:$0xff] }
  0x76   : > { %1185 = vmatpush1.bf16.msra.mxu1 %v1184_v17 }
  0x77   : > { %1187 = vmatprep.subr.bf16.mxu1 %v1186_v18 }
  0x7a   : > { %1189 = vmatpush1.bf16.msra.mxu1 %v1188_v23  ;;  %v504_v23 = vld [vmem:[#allocation5 + $0x30] sm:$0xff] }
  0x7b   : > { %1191 = vmatprep.subr.bf16.mxu1 %v1190_v25  ;;  %v507_v25 = vld [vmem:[#allocation5 + $0x48] sm:$0xff]  ;;  %v1096_v28 = vpack.c.bf16 %v504_v23, %v502_v22  ;;  %v544_v22 = vld [vmem:[#allocation5 + $0x170] sm:$0xff] }
  0x7c   : > { %v1098_v29 = vpack.c.bf16 %v509_v26, %v507_v25  ;;  %v547_v23 = vld [vmem:[#allocation5 + $0x188] sm:$0xff]  ;;  %v549_v25 = vld [vmem:[#allocation5 + $0x198] sm:$0xff] }
  0x7e   : > { %1193 = vmatpush1.bf16.msra.mxu1 %v1192_v30  ;;  %v506_v30 = vld [vmem:[#allocation5 + $0x40] sm:$0xff] }
  0x7f   : > { %1195 = vmatprep.subr.bf16.mxu1 %v1194_v31  ;;  %v508_v31 = vld [vmem:[#allocation5 + $0x50] sm:$0xff] }
  0x80   : > { %v1100_v34 = vpack.c.bf16 %v508_v31, %v506_v30  ;;  %v551_v30 = vld [vmem:[#allocation5 + $0x1a8] sm:$0xff]  ;;  %v553_v31 = vld [vmem:[#allocation5 + $0x1b8] sm:$0xff] }
  0x81   : > { %v1142_v33 = vpack.c.bf16 %v553_v31, %v551_v30  ;;  %v638_v31 = vld [vmem:[#allocation5 + $0x460] sm:$0xff] }
  0x82   : > { %1197 = vmatpush1.bf16.msra.mxu1 %v1196_v36  ;;  %v510_v36 = vld [vmem:[#allocation5 + $0x60] sm:$0xff] }
  0x83   : > { %1199 = vmatprep.subr.bf16.mxu1 %v1198_v37  ;;  %v512_v37 = vld [vmem:[#allocation5 + $0x70] sm:$0xff] }
  0x86   : > { %1201 = vmatpush1.bf16.msra.mxu1 %v1200_v42  ;;  %v516_v42 = vld [vmem:[#allocation5 + $0x90] sm:$0xff] }
  0x87   : > { %1203 = vmatprep.subr.bf16.mxu1 %v1202_v43  ;;  %v519_v43 = vld [vmem:[#allocation5 + $0xa8] sm:$0xff]  ;;  %v1108_v45 = vpack.c.bf16 %v516_v42, %v514_v41 }
  0x88   : > { %v1110_v46 = vpack.c.bf16 %v521_v44, %v519_v43  ;;  %v623_v41 = vld [vmem:[#allocation5 + $0x3e8] sm:$0xff]  ;;  %v625_v43 = vld [vmem:[#allocation5 + $0x3f8] sm:$0xff]  ;;  %v622_v44 = vld [vmem:[#allocation5 + $0x3e0] sm:$0xff] }
  0x8a   : > { %1205 = vmatpush1.bf16.msra.mxu1 %v1204_v48  ;;  %v520_v48 = vld [vmem:[#allocation5 + $0xb0] sm:$0xff] }
  0x8b   : > { %1207 = vmatprep.subr.bf16.mxu1 %v1206_v49  ;;  %v523_v49 = vld [vmem:[#allocation5 + $0xc8] sm:$0xff]  ;;  %v1112_v51 = vpack.c.bf16 %v520_v48, %v518_v47 }
  0x8c   : > { %v1114_v52 = vpack.c.bf16 %v525_v50, %v523_v49  ;;  %v559_v48 = vld [vmem:[#allocation5 + $0x1e8] sm:$0xff]  ;;  %v561_v49 = vld [vmem:[#allocation5 + $0x1f8] sm:$0xff] }
  0x8d   : > { %v1150_v50 = vpack.c.bf16 %v561_v49, %v559_v48  ;;  %v650_v48 = vld [vmem:[#allocation5 + $0x4c0] sm:$0xff]  ;;  %v652_v49 = vld [vmem:[#allocation5 + $0x4d0] sm:$0xff] }
  0x8e   : > { %1209 = vmatpush1.bf16.msra.mxu1 %v1208_v54  ;;  %v524_v54 = vld [vmem:[#allocation5 + $0xd0] sm:$0xff] }
  0x8f   : > { %1211 = vmatprep.subr.bf16.mxu1 %v1210_v55  ;;  %v527_v55 = vld [vmem:[#allocation5 + $0xe8] sm:$0xff]  ;;  %v1116_v57 = vpack.c.bf16 %v524_v54, %v522_v53 }
  0x90   : > { %v627_v53 = vld [vmem:[#allocation5 + $0x408] sm:$0xff] }
  0x92   : > { %1213 = vmatpush1.bf16.msra.mxu1 %v1212_v58  ;;  %v1118_v58 = vpack.c.bf16 %v529_v56, %v527_v55  ;;  %v629_v55 = vld [vmem:[#allocation5 + $0x418] sm:$0xff] }
  0x93   : > { %v1218_v56 = vpack.c.bf16 %v629_v55, %v627_v53  ;;  %v656_v55 = vld [vmem:[#allocation5 + $0x4f0] sm:$0xff] }
  0xd6   : > { %v317_v1 = vpop.permute.xlu0 %316  ;;  %v322_v2 = vpop.permute.xlu1 %321 }
  0xd7   : > { %v329_v3 = vmul.f32 %v327_v63, %v322_v2  ;;  %v328_v4 = vmul.f32 %v327_v63, %v317_v1  ;;  %v533_v63 = vld [vmem:[#allocation5 + $0x118] sm:$0xff]  ;;  %v1120_v1 = vpack.c.bf16 %v528_v60, %v526_v59  ;;  %v626_v60 = vld [vmem:[#allocation5 + $0x400] sm:$0xff] }
  0xd8   : > { %v1122_v2 = vpack.c.bf16 %v533_v63, %v531_v62  ;;  %v628_v62 = vld [vmem:[#allocation5 + $0x410] sm:$0xff] }
  0xd9   : > { %v337_v7 = vadd.f32 %v1051_v6, %v329_v3  ;;  %v336_v10 = vadd.f32 %v1051_v6, %v328_v4  ;;  %v530_v3 = vld [vmem:[#allocation5 + $0x100] sm:$0xff]  ;;  %v532_v4 = vld [vmem:[#allocation5 + $0x110] sm:$0xff]  ;;  %v537_v6 = vld [vmem:[#allocation5 + $0x138] sm:$0xff] }
  0xdb   : > { %v340_v8 = vpop.permute.xlu0 %339  ;;  %v344_v9 = vpop.permute.xlu1 %343 }
  0xdc   : > { %v350_v11 = vmul.f32 %v349_v5, %v340_v8  ;;  %v351_v12 = vmul.f32 %v349_v5, %v344_v9  ;;  %v535_v5 = vld [vmem:[#allocation5 + $0x128] sm:$0xff]  ;;  %v534_v9 = vld [vmem:[#allocation5 + $0x120] sm:$0xff] }
  0xdd   : > { %v1126_v8 = vpack.c.bf16 %v537_v6, %v535_v5  ;;  %v1220_v6 = vpack.c.bf16 %v628_v62, %v626_v60  ;;  %v658_v60 = vld [vmem:[#allocation5 + $0x500] sm:$0xff]  ;;  %v660_v62 = vld [vmem:[#allocation5 + $0x510] sm:$0xff] }
  0xde   : > { %v352_v17 = vadd.f32 %v350_v11, %v336_v10  ;;  %v353_v18 = vadd.f32 %v351_v12, %v337_v7  ;;  %v1124_v7 = vpack.c.bf16 %v532_v4, %v530_v3  ;;  %v536_v10 = vld [vmem:[#allocation5 + $0x130] sm:$0xff]  ;;  %v539_v11 = vld [vmem:[#allocation5 + $0x148] sm:$0xff]  ;;  %v541_v12 = vld [vmem:[#allocation5 + $0x158] sm:$0xff] }
  0xdf   : > { %v1128_v13 = vpack.c.bf16 %v536_v10, %v534_v9  ;;  %v1130_v14 = vpack.c.bf16 %v541_v12, %v539_v11  ;;  %v630_v9 = vld [vmem:[#allocation5 + $0x420] sm:$0xff]  ;;  %v632_v10 = vld [vmem:[#allocation5 + $0x430] sm:$0xff] }
  0xe0   : > { %v354_v20 = vmax.f32 %v352_v17, 0.0  ;;  %v355_v27 = vmax.f32 %v353_v18, 0.0  ;;  %v543_v17 = vld [vmem:[#allocation5 + $0x168] sm:$0xff]  ;;  %v545_v18 = vld [vmem:[#allocation5 + $0x178] sm:$0xff] }
  0xe2   : > { %1052 = vmatmul.mubr.msk.f32.vlgmr.msra.gmra.mrb[0].mxu0 %vm384_vm0, %v354_v20  ;;  %v1134_v20 = vpack.c.bf16 %v545_v18, %v543_v17 }
  0xe3   : > { %461 = vmatprep.mubr.f32.mxu0 %v1499_v24  ;;  %1093 = vmatpush1.bf16.msra.mxu0 %v1092_v19  ;;  %v1104_v24 = vpack.c.bf16 %v512_v37, %v510_v36  ;;  %v1132_v19 = vpack.c.bf16 %v540_v16, %v538_v15  ;;  %v555_v36 = vld [vmem:[#allocation5 + $0x1c8] sm:$0xff]  ;;  %v557_v37 = vld [vmem:[#allocation5 + $0x1d8] sm:$0xff] }
  0xe4   : > { %1095 = vmatprep.subr.bf16.mxu0 %v1094_v21  ;;  %v542_v21 = vld [vmem:[#allocation5 + $0x160] sm:$0xff]  ;;  %v1146_v39 = vpack.c.bf16 %v557_v37, %v555_v36 }
  0xe5   : > { %v1136_v26 = vpack.c.bf16 %v544_v22, %v542_v21  ;;  %v634_v21 = vld [vmem:[#allocation5 + $0x440] sm:$0xff]  ;;  %v636_v22 = vld [vmem:[#allocation5 + $0x450] sm:$0xff] }
  0xe6   : > { %1053 = vmatmul.mubr.msk.f32.gmra.mrb[2].mxu0 %vm384_vm0, %v355_v27  ;;  %v1138_v27 = vpack.c.bf16 %v549_v25, %v547_v23  ;;  %v639_v25 = vld [vmem:[#allocation5 + $0x468] sm:$0xff]  ;;  %v642_v37 = vld [vmem:[#allocation5 + $0x480] sm:$0xff] }
  0xe7   : > { %1097 = vmatpush1.bf16.msra.mxu0 %v1096_v28  ;;  %v546_v28 = vld [vmem:[#allocation5 + $0x180] sm:$0xff] }
  0xe8   : > { %1099 = vmatprep.subr.bf16.mxu0 %v1098_v29  ;;  %v548_v29 = vld [vmem:[#allocation5 + $0x190] sm:$0xff] }
  0xe9   : > { %v1140_v32 = vpack.c.bf16 %v548_v29, %v546_v28  ;;  %v1228_v29 = vpack.c.bf16 %v636_v22, %v634_v21  ;;  %v672_v21 = vld [vmem:[#allocation5 + $0x570] sm:$0xff]  ;;  %v675_v22 = vld [vmem:[#allocation5 + $0x588] sm:$0xff] }
  0xeb   : > { %1101 = vmatpush1.bf16.msra.mxu0 %v1100_v34  ;;  %v550_v34 = vld [vmem:[#allocation5 + $0x1a0] sm:$0xff] }
  0xec   : > { %1103 = vmatprep.subr.bf16.mxu0 %v1102_v35  ;;  %v552_v35 = vld [vmem:[#allocation5 + $0x1b0] sm:$0xff] }
  0xed   : > { %v1144_v38 = vpack.c.bf16 %v552_v35, %v550_v34  ;;  %v645_v34 = vld [vmem:[#allocation5 + $0x498] sm:$0xff] }
  0xef   : > { %1105 = vmatpush1.bf16.msra.mxu0 %v1104_v24  ;;  %v554_v24 = vld [vmem:[#allocation5 + $0x1c0] sm:$0xff] }
  0xf0   : > { %1107 = vmatprep.subr.bf16.mxu0 %v1106_v40  ;;  %v556_v40 = vld [vmem:[#allocation5 + $0x1d0] sm:$0xff] }
  0xf1   : > { %v1148_v42 = vpack.c.bf16 %v556_v40, %v554_v24  ;;  %v649_v24 = vld [vmem:[#allocation5 + $0x4b8] sm:$0xff] }
  0xf3   : > { %1109 = vmatpush1.bf16.msra.mxu0 %v1108_v45  ;;  %v624_v45 = vld [vmem:[#allocation5 + $0x3f0] sm:$0xff] }
  0xf4   : > { %1111 = vmatprep.subr.bf16.mxu0 %v1110_v46  ;;  %v1214_v46 = vpack.c.bf16 %v625_v43, %v623_v41  ;;  %v1216_v47 = vpack.c.bf16 %v624_v45, %v622_v44  ;;  %v648_v43 = vld [vmem:[#allocation5 + $0x4b0] sm:$0xff]  ;;  %v651_v44 = vld [vmem:[#allocation5 + $0x4c8] sm:$0xff]  ;;  %v653_v45 = vld [vmem:[#allocation5 + $0x4d8] sm:$0xff] }
  0xf6   : > { %1215 = vmatprep.subr.bf16.mxu1 %v1214_v46 }
  0xf7   : > { %1113 = vmatpush1.bf16.msra.mxu0 %v1112_v51  ;;  %v558_v51 = vld [vmem:[#allocation5 + $0x1e0] sm:$0xff]  ;;  %1217 = vmatpush1.bf16.msra.mxu1 %v1216_v47  ;;  %v1242_v47 = vpack.c.bf16 %v653_v45, %v651_v44  ;;  %v688_v45 = vld [vmem:[#allocation5 + $0x5f0] sm:$0xff] }
  0xf8   : > { %1115 = vmatprep.subr.bf16.mxu0 %v1114_v52  ;;  %v560_v52 = vld [vmem:[#allocation5 + $0x1f0] sm:$0xff]  ;;  %1219 = vmatprep.subr.bf16.mxu1 %v1218_v56  ;;  %v659_v56 = vld [vmem:[#allocation5 + $0x508] sm:$0xff]  ;;  %v686_v44 = vld [vmem:[#allocation5 + $0x5e0] sm:$0xff] }
  0xf9   : > { %v1152_v54 = vpack.c.bf16 %v560_v52, %v558_v51  ;;  %v657_v51 = vld [vmem:[#allocation5 + $0x4f8] sm:$0xff]  ;;  %v1244_v52 = vpack.c.bf16 %v652_v49, %v650_v48 }
  0xfb   : > { %1117 = vmatpush1.bf16.msra.mxu0 %v1116_v57  ;;  %v372_v57 = vld [vmem:[%s1787_s4] sm:$0x3] }
  0xfc   : > { %1119 = vmatprep.subr.bf16.mxu0 %v1118_v58  ;;  %v377_v58 = vrot.slane %v372_v57, %v1668_v61  ;;  %v381_v59 = vrot.slane %v372_v57, %v1674_v0  ;;  %v661_v57 = vld [vmem:[#allocation5 + $0x518] sm:$0xff] }
  0xff   : > { %1121 = vmatpush1.bf16.msra.mxu0 %v1120_v1  ;;  %v631_v1 = vld [vmem:[#allocation5 + $0x428] sm:$0xff] }
 0x100   : > { %1123 = vmatprep.subr.bf16.mxu0 %v1122_v2  ;;  %v633_v2 = vld [vmem:[#allocation5 + $0x438] sm:$0xff] }
 0x103   : > { %1125 = vmatpush1.bf16.msra.mxu0 %v1124_v7  ;;  %v664_v7 = vld [vmem:[#allocation5 + $0x530] sm:$0xff] }
 0x104   : > { %1127 = vmatprep.subr.bf16.mxu0 %v1126_v8  ;;  %v1222_v8 = vpack.c.bf16 %v633_v2, %v631_v1  ;;  %v665_v1 = vld [vmem:[#allocation5 + $0x538] sm:$0xff]  ;;  %v1252_v2 = vpack.c.bf16 %v660_v62, %v658_v60 }
 0x107   : > { %1129 = vmatpush1.bf16.msra.mxu0 %v1128_v13  ;;  %v635_v13 = vld [vmem:[#allocation5 + $0x448] sm:$0xff] }
 0x108   : > { %1131 = vmatprep.subr.bf16.mxu0 %v1130_v14  ;;  %v637_v14 = vld [vmem:[#allocation5 + $0x458] sm:$0xff] }
 0x10b   : > { %1133 = vmatpush1.bf16.msra.mxu0 %v1132_v19  ;;  %v1224_v19 = vpack.c.bf16 %v632_v10, %v630_v9  ;;  %v669_v9 = vld [vmem:[#allocation5 + $0x558] sm:$0xff] }
 0x10c   : > { %1135 = vmatprep.subr.bf16.mxu0 %v1134_v20  ;;  %v1226_v20 = vpack.c.bf16 %v637_v14, %v635_v13  ;;  %v668_v13 = vld [vmem:[#allocation5 + $0x550] sm:$0xff]  ;;  %v671_v14 = vld [vmem:[#allocation5 + $0x568] sm:$0xff] }
 0x10f   : > { %1137 = vmatpush1.bf16.msra.mxu0 %v1136_v26  ;;  %v641_v26 = vld [vmem:[#allocation5 + $0x478] sm:$0xff] }
 0x110   : > { %1139 = vmatprep.subr.bf16.mxu0 %v1138_v27  ;;  %v1230_v30 = vpack.c.bf16 %v641_v26, %v639_v25 }
 0x113   : > { %1141 = vmatpush1.bf16.msra.mxu0 %v1140_v32  ;;  %v640_v32 = vld [vmem:[#allocation5 + $0x470] sm:$0xff] }
 0x114   : > { %1143 = vmatprep.subr.bf16.mxu0 %v1142_v33  ;;  %v643_v33 = vld [vmem:[#allocation5 + $0x488] sm:$0xff]  ;;  %v1232_v35 = vpack.c.bf16 %v640_v32, %v638_v31 }
 0x115   : > { %v1234_v36 = vpack.c.bf16 %v645_v34, %v643_v33  ;;  %v678_v33 = vld [vmem:[#allocation5 + $0x5a0] sm:$0xff]  ;;  %v680_v34 = vld [vmem:[#allocation5 + $0x5b0] sm:$0xff] }
 0x117   : > { %1145 = vmatpush1.bf16.msra.mxu0 %v1144_v38  ;;  %v644_v38 = vld [vmem:[#allocation5 + $0x490] sm:$0xff] }
 0x118   : > { %1147 = vmatprep.subr.bf16.mxu0 %v1146_v39  ;;  %v647_v39 = vld [vmem:[#allocation5 + $0x4a8] sm:$0xff]  ;;  %v1236_v40 = vpack.c.bf16 %v644_v38, %v642_v37  ;;  %v1272_v37 = vpack.c.bf16 %v680_v34, %v678_v33 }
 0x119   : > { %v1238_v41 = vpack.c.bf16 %v649_v24, %v647_v39  ;;  %v682_v39 = vld [vmem:[#allocation5 + $0x5c0] sm:$0xff]  ;;  %v684_v24 = vld [vmem:[#allocation5 + $0x5d0] sm:$0xff] }
 0x11b   : > { %1149 = vmatpush1.bf16.msra.mxu0 %v1148_v42  ;;  %v646_v42 = vld [vmem:[#allocation5 + $0x4a0] sm:$0xff] }
 0x11c   : > { %1151 = vmatprep.subr.bf16.mxu0 %v1150_v50  ;;  %v1240_v46 = vpack.c.bf16 %v648_v43, %v646_v42  ;;  %v655_v50 = vld [vmem:[#allocation5 + $0x4e8] sm:$0xff]  ;;  %v1276_v42 = vpack.c.bf16 %v684_v24, %v682_v39 }
 0x11d   : > { %v1246_v53 = vpack.c.bf16 %v657_v51, %v655_v50 }
 0x11f   : > { %1153 = vmatpush1.bf16.msra.mxu0 %v1152_v54  ;;  %v654_v54 = vld [vmem:[#allocation5 + $0x4e0] sm:$0xff] }
 0x1b5   : > { %v457_v63 = vpop.f32.mrb[0].mxu0 }
 0x1b6   : > { %v1688_v3 = vadd.f32 %v457_v63, %v377_v58  ;;  %v459_v4 = vpop.f32.mrb[1].mxu0  ;;  %v663_v63 = vld [vmem:[#allocation5 + $0x528] sm:$0xff] }
 0x1b7   : > { %v1690_v5 = vadd.f32 %v459_v4, %v381_v59  ;;  %v1254_v4 = vpack.c.bf16 %v665_v1, %v663_v63 }
 0x1b8   : > { %v472_v15 = vrot.slane %v1688_v3, 7 }
 0x1b9   : > { %v463_v11 = vpop.f32.mrb[2].mxu0  ;;  %843 = vmatprep.mubr.f32.mxu1 %v1690_v5  ;;  %v473_v12 = vrot.slane %v1690_v5, 7  ;;  %v486_v23 = vrot.slane %v1690_v5, 1 }
 0x1ba   : > { %v1699_v16 = vadd.f32 %v463_v11, %v377_v58  ;;  %v465_v17 = vpop.f32.mrb[3].mxu0  ;;  %844 = vmatmul.mubr.f32.vlgmr.msra.gmra.mrb[0].mxu1 %v1688_v3  ;;  %v1248_v58 = vpack.c.bf16 %v656_v55, %v654_v54  ;;  %v690_v54 = vld [vmem:[%s1789_s6] sm:$0x3] }
 0x1bb   : > { %v1702_v18 = vadd.f32 %v465_v17, %v381_v59  ;;  %1221 = vmatpush1.bf16.msra.mxu1 %v1220_v6  ;;  %1055 = vmatprep.mubr.msk.f32.mxu0 %vm1692_vm2, %v473_v12  ;;  %v1250_v59 = vpack.c.bf16 %v661_v57, %v659_v56  ;;  %v662_v6 = vld [vmem:[#allocation5 + $0x520] sm:$0xff]  ;;  %v695_v55 = vrot.slane %v690_v54, %v1668_v61 }
 0x1bc   : > { %1057 = vmatmul.mubr.msk.f32.vlgmr.msra.gmra.mrb[4].mxu0 %vm1692_vm2, %v472_v15  ;;  %1223 = vmatprep.subr.bf16.mxu1 %v1222_v8  ;;  %v474_v28 = vrot.slane %v1699_v16, 7  ;;  %v667_v8 = vld [vmem:[#allocation5 + $0x548] sm:$0xff]  ;;  %v1256_v10 = vpack.c.bf16 %v664_v7, %v662_v6  ;;  %v666_v12 = vld [vmem:[#allocation5 + $0x540] sm:$0xff]  ;;  %v673_v15 = vld [vmem:[#allocation5 + $0x578] sm:$0xff]  ;;  %v487_v49 = vrot.slane %v1699_v16, 1  ;;  %v699_v56 = vrot.slane %v690_v54, %v1674_v0 }
 0x1bd   : > { %849 = vmatprep.mubr.f32.mxu1 %v1702_v18  ;;  %v475_v27 = vrot.slane %v1702_v18, 7  ;;  %v1258_v11 = vpack.c.bf16 %v669_v9, %v667_v8  ;;  %v1260_v17 = vpack.c.bf16 %v668_v13, %v666_v12  ;;  %v488_v48 = vrot.slane %v1702_v18, 1 }
 0x1be   : > { %850 = vmatmul.mubr.f32.gmra.mrb[2].mxu1 %v1699_v16 }
 0x1bf   : > { %1225 = vmatpush1.bf16.msra.mxu1 %v1224_v19  ;;  %1062 = vmatprep.mubr.msk.f32.mxu1 %vm493_vm3, %v486_v23  ;;  %v1262_v19 = vpack.c.bf16 %v673_v15, %v671_v14  ;;  %v677_v23 = vld [vmem:[#allocation5 + $0x598] sm:$0xff] }
 0x1c0   : > { %1227 = vmatprep.subr.bf16.mxu1 %v1226_v20  ;;  %1059 = vmatprep.mubr.msk.f32.mxu0 %vm1692_vm2, %v475_v27  ;;  %v670_v20 = vld [vmem:[#allocation5 + $0x560] sm:$0xff]  ;;  %v1266_v26 = vpack.c.bf16 %v677_v23, %v675_v22 }
 0x1c1   : > { %1061 = vmatmul.mubr.msk.f32.gmra.mrb[6].mxu0 %vm1692_vm2, %v474_v28  ;;  %v1264_v25 = vpack.c.bf16 %v672_v21, %v670_v20  ;;  %v674_v27 = vld [vmem:[#allocation5 + $0x580] sm:$0xff]  ;;  %v676_v28 = vld [vmem:[#allocation5 + $0x590] sm:$0xff] }
 0x1c2   : > { %v1268_v31 = vpack.c.bf16 %v676_v28, %v674_v27 }
 0x1c3   : > { %1229 = vmatpush1.bf16.msra.mxu1 %v1228_v29  ;;  %v679_v29 = vld [vmem:[#allocation5 + $0x5a8] sm:$0xff] }
 0x1c4   : > { %1231 = vmatprep.subr.bf16.mxu1 %v1230_v30  ;;  %v681_v30 = vld [vmem:[#allocation5 + $0x5b8] sm:$0xff] }
 0x1c5   : > { %v1270_v32 = vpack.c.bf16 %v681_v30, %v679_v29 }
 0x1c7   : > { %1233 = vmatpush1.bf16.msra.mxu1 %v1232_v35  ;;  %v683_v35 = vld [vmem:[#allocation5 + $0x5c8] sm:$0xff] }
 0x1c8   : > { %1235 = vmatprep.subr.bf16.mxu1 %v1234_v36  ;;  %v685_v36 = vld [vmem:[#allocation5 + $0x5d8] sm:$0xff] }
 0x1c9   : > { %v1274_v38 = vpack.c.bf16 %v685_v36, %v683_v35 }
 0x1cb   : > { %1237 = vmatpush1.bf16.msra.mxu1 %v1236_v40  ;;  %v687_v40 = vld [vmem:[#allocation5 + $0x5e8] sm:$0xff] }
 0x1cc   : > { %1239 = vmatprep.subr.bf16.mxu1 %v1238_v41  ;;  %v689_v41 = vld [vmem:[#allocation5 + $0x5f8] sm:$0xff] }
 0x1cd   : > { %v1278_v43 = vpack.c.bf16 %v689_v41, %v687_v40 }
 0x1cf   : > { %1241 = vmatpush1.bf16.msra.mxu1 %v1240_v46  ;;  %v1280_v46 = vpack.c.bf16 %v688_v45, %v686_v44 }
 0x1d0   : > { %1243 = vmatprep.subr.bf16.mxu1 %v1242_v47  ;;  %v485_v47 = vrot.slane %v1688_v3, 1 }
 0x1d3   : > { %1245 = vmatpush1.bf16.msra.mxu1 %v1244_v52 }
 0x1d4   : > { %1247 = vmatprep.subr.bf16.mxu1 %v1246_v53 }
 0x1d7   : > { %1249 = vmatpush1.bf16.msra.mxu1 %v1248_v58 }
 0x1d8   : > { %1251 = vmatprep.subr.bf16.mxu1 %v1250_v59 }
 0x1db   : > { %1253 = vmatpush1.bf16.msra.mxu1 %v1252_v2 }
 0x1dc   : > { %1255 = vmatprep.subr.bf16.mxu1 %v1254_v4 }
 0x1df   : > { %1257 = vmatpush1.bf16.msra.mxu1 %v1256_v10 }
 0x1e0   : > { %1259 = vmatprep.subr.bf16.mxu1 %v1258_v11 }
 0x1e3   : > { %1261 = vmatpush1.bf16.msra.mxu1 %v1260_v17 }
 0x1e4   : > { %1263 = vmatprep.subr.bf16.mxu1 %v1262_v19 }
 0x1e7   : > { %1265 = vmatpush1.bf16.msra.mxu1 %v1264_v25 }
 0x1e8   : > { %1267 = vmatprep.subr.bf16.mxu1 %v1266_v26 }
 0x1eb   : > { %1269 = vmatpush1.bf16.msra.mxu1 %v1268_v31 }
 0x1ec   : > { %1271 = vmatprep.subr.bf16.mxu1 %v1270_v32 }
 0x1ef   : > { %1273 = vmatpush1.bf16.msra.mxu1 %v1272_v37 }
 0x1f0   : > { %1275 = vmatprep.subr.bf16.mxu1 %v1274_v38 }
 0x1f3   : > { %1277 = vmatpush1.bf16.msra.mxu1 %v1276_v42 }
 0x1f4   : > { %1279 = vmatprep.subr.bf16.mxu1 %v1278_v43 }
 0x1f7   : > { %1281 = vmatpush1.bf16.msra.mxu1 %v1280_v46 }
 0x1fa   : > { %1063 = vmatmul.mubr.msk.f32.vlgmr.msra.gmra.mrb[0].mxu1 %vm493_vm3, %v485_v47 }
 0x1fb   : > { %1064 = vmatprep.mubr.msk.f32.mxu1 %vm493_vm3, %v488_v48 }
 0x1fe   : > { %1065 = vmatmul.mubr.msk.f32.gmra.mrb[2].mxu1 %vm493_vm3, %v487_v49 }
 0x28f   : > { %v768_v50 = vpop.f32.mrb[4].mxu0 }
 0x290   : > { %v770_v51 = vpop.f32.mrb[5].mxu0  ;;  %v769_v57 = vadd.f32 %v768_v50, %v695_v55 }
 0x291   : > { %v771_v58 = vadd.f32 %v770_v51, %v699_v56 }
 0x294   : > { %v774_v52 = vpop.f32.mrb[6].mxu0 }
 0x295   : > { %v776_v53 = vpop.f32.mrb[7].mxu0  ;;  %v775_v1 = vadd.f32 %v774_v52, %v695_v55 }
 0x296   : > { %v777_v4 = vadd.f32 %v776_v53, %v699_v56 }
 0x2cd   : > { %v922_v59 = vpop.f32.mrb[0].mxu1 }
 0x2ce   : > { %v1283_v60 = vadd.f32 %v922_v59, %v769_v57  ;;  %v924_v62 = vpop.f32.mrb[1].mxu1 }
 0x2cf   : > { %v1285_v63 = vadd.f32 %v924_v62, %v771_v58 }
 0x2d0   : > { %v933_v2 = vadd.f32 %v1283_v60, %v1688_v3 }
 0x2d1   : > { %v934_v6 = vadd.f32 %v1285_v63, %v1690_v5  ;;  %v928_v61 = vpop.f32.mrb[2].mxu1 }
 0x2d2   : > { %937 = vst [vmem:[%s302_s16] sm:$0xff] %v933_v2  ;;  %v1287_v0 = vadd.f32 %v928_v61, %v775_v1  ;;  %v930_v7 = vpop.f32.mrb[3].mxu1 }
 0x2d3   : > { %938 = vst [vmem:[%s302_s16 + $0x8] sm:$0xff] %v934_v6  ;;  %v1289_v8 = vadd.f32 %v930_v7, %v777_v4 }
 0x2d4   : > { %v935_v3 = vadd.f32 %v1287_v0, %v1699_v16 }
 0x2d5   : > { %v936_v5 = vadd.f32 %v1289_v8, %v1702_v18 }
 0x2d6   : > { %939 = vst [vmem:[%s302_s16 + $0x10] sm:$0xff] %v935_v3 }
 0x2d7   : > { %940 = vst [vmem:[%s302_s16 + $0x18] sm:$0xff] %v936_v5 }
 0x2d8   : > { %1434 = shalt.err (!%p1431_p11)
}
 0x2d9   : > { %s1435_s8 = scalar_lea.hbm %s1739_s20, 512  ;;  %s1439_s10 = scalar_lea.hbm %s1790_s7, 1024 }
 0x2da   : > { %p1436_p13 = scmp.ne.s32.totalorder %s1739_s20, %s1435_s8  ;;  %p1440_p6 = scmp.lt.u32.totalorder %s1739_s20, %s1790_s7 }
 0x2db   : > { %p1441_p9 = scmp.lt.u32.totalorder %s1439_s10, %s1435_s8  ;;  %p1443_p10 = scmp.lt.u32.totalorder %s1435_s8, %s1739_s20 }
 0x2dc   : > { %p1437_p5 = pnand %p1436_p13, %p1806_p1 }
 0x2dd   : > { %p1442_p12 = por %p1441_p9, %p1440_p6 }
 0x2de   : > { %p1438_p0 = pneg %p1437_p5 }
 0x2df   : > { %p1444_p2 = por %p1443_p10, %p1442_p12 }
 0x2e1   : > { %p1445_p3 = pnand %p1444_p2, %p1438_p0 }
 0x2e3   : > { %1448 = shalt.err (!%p1445_p3)
}
 0x2e4   : > { %s1501_s18 = smov 256   ;;  %s1502_s14 = smov 16  }
 0x2e5   : > { %1302 = dma.vmem_to_hbm [thread:$0]  (%p1806_p1), %s1733_s13, 512, %s1739_s20, %s1742_s28, %s1501_s18, %s1501_s18, %s1502_s14  }
 0x2e6 PF: > { %p1319_p4 = scmp.ge.s32.totalorder %s1491_s27, 2  ;;  %s971_s17 = sand.u32 1, %s1479_s24  }
 0x2e7   : > { %p1807_p7 = scmp.ne.s32.totalorder %s1796_s12, 0  ;;  %s972_s21 = scalar_lea.sflag [#allocation4], %s971_s17 }
 0x2e9   : > { %p1312_p8 = pnand %p1319_p4, %p1807_p7 }
 0x2eb   : > { %1474 = dma.done.wait (!%p1312_p8), %s972_s21, 512  }
 0x2ec   : > { %1476 = vsyncadd (!%p1312_p8), %s972_s21, 4294966784  ;;  %s1808_s22 = sld [smem:[#allocation11_spill]]  ;;  %p19_p11 = scmp.ge.s32.totalorder %s1568_s30, 4  }
 0x2ed   : > { %s1809_s24 = smov %s1483_s25  ;;  %s1810_s25 = smov %s1487_s26 }
 0x2ee   : > { %s1812_s27 = smov %s1568_s30  ;;  %21 = sbr.rel (!%p19_p11) target bundleno = 5 (0x5), region = 92 }
 0x2f2   : > { %s1811_s26 = smov %s1808_s22 }
 0x2f5   :  { %977 = vsyncpa [#allocation3], 1 }
 0x2f6   :  { %979 = vsyncpa [#allocation3 + $0x1], 1 }
 0x2f7   :  { %980 = vsyncpa [#allocation6], 1 }
 0x2f8   :  { %981 = vsyncpa [#allocation4], 1 }
 0x2f9   :  { %983 = vsyncpa [#allocation4 + $0x1], 1 }

</bundles_post_ra>
